<compile_context>
chip_gen: v7x
topology: tpu7x:2x2x1
jax: 0.10.0
libtpu: 0.0.40
codegen_flags: <defaults>
</compile_context>

<pallas_src>
import functools

import jax
import jax.numpy as jnp
from jax.experimental import pallas as pl
from jax.experimental.pallas import tpu as pltpu

EPS = 1e-8
ENTROPY_WEIGHT = 2.0


def _round_up(x, m):
    return ((x + m - 1) // m) * m


def _scan_partials_kernel(anchors_ref, neighbors_ref, col_out_ref, logsim_out_ref,
                          *, true_b, tb, pad_rows):
    a = anchors_ref[...].astype(jnp.float32)      # (TB, N)
    nb = neighbors_ref[...].astype(jnp.float32)   # (TB, N)

    # Numerically-stable softmax pieces.  Neither side is materialized as a
    # probability tensor; normalizations are folded into (TB, 1) scalars.
    a_max = jnp.max(a, axis=1, keepdims=True)
    a_exp = jnp.exp(a - a_max)                                   # (TB, N)
    inv_sa = 1.0 / jnp.sum(a_exp, axis=1, keepdims=True)         # (TB, 1)

    n_max = jnp.max(nb, axis=1, keepdims=True)
    n_exp = jnp.exp(nb - n_max)                                  # (TB, N)
    inv_sn = 1.0 / jnp.sum(n_exp, axis=1, keepdims=True)         # (TB, 1)

    # similarity[i] = <anchors_prob[i], positives_prob[i]>
    #              = rowsum(a_exp * n_exp) * inv_sa * inv_sn
    sim = jnp.sum(a_exp * n_exp, axis=1, keepdims=True) * inv_sa * inv_sn
    # BCE(sim, 1) contribution: -log(sim), log clamped at -100 (torch BCELoss).
    log_sim = jnp.maximum(jnp.log(sim), -100.0)                  # (TB, 1)

    if pad_rows:
        # Only the final (ragged) tile has padded rows; mask is folded into the
        # cheap (TB, 1) per-row scalars — no full-tile mask multiply.
        i = pl.program_id(0)
        row_idx = i * tb + jax.lax.broadcasted_iota(jnp.int32, (tb, 1), 0)
        valid = (row_idx < true_b).astype(jnp.float32)           # (TB, 1)
        inv_sa_m = inv_sa * valid
        log_sim = log_sim * valid
    else:
        inv_sa_m = inv_sa

    # Per-block partial of the clamped-log(sim) sum.
    logsim_out_ref[0] = jnp.sum(log_sim, axis=0, keepdims=True)  # (1, 1)

    # Per-block partial column-sum of anchors_prob, computed on the MXU:
    #   (valid * inv_sa)^T @ a_exp  ->  (1, N)
    col_out_ref[0] = jax.lax.dot_general(
        inv_sa_m, a_exp,
        dimension_numbers=(((0,), (0,)), ((), ())),
        preferred_element_type=jnp.float32)


def _scan_finalize_kernel(col_ref, logsim_ref, out_ref, *, entropy_weight, true_b):
    inv_b = jnp.float32(1.0 / true_b)
    consistency = -jnp.sum(logsim_ref[...]) * inv_b
    p = jnp.maximum(jnp.sum(col_ref[...], axis=0, keepdims=True) * inv_b, EPS)  # (1, N)
    entropy = -jnp.sum(p * jnp.log(p))
    out_ref[0] = consistency - entropy_weight * entropy
    out_ref[1] = consistency
    out_ref[2] = entropy


def scan_loss(anchors, neighbors, entropy_weight=ENTROPY_WEIGHT, block_rows=None):
    """Returns (total_loss, consistency_loss, entropy_loss) as f32 scalars."""
    assert anchors.shape == neighbors.shape and anchors.ndim == 2
    B, N = anchors.shape

    if block_rows is None:
        # Target ~1 MiB of lane-padded (f32) footprint per input block so the
        # ~0.35 us/step overhead is amortized; floor/cap keep the temporaries
        # and double-buffered inputs comfortably inside VMEM.
        lane_n = _round_up(N, 128)
        block_rows = (1 << 20) // (lane_n * 4)
        block_rows = max(128, min(block_rows, 2048))
    tb = min(_round_up(block_rows, 8), _round_up(B, 8))
    b_pad = _round_up(B, tb)
    if b_pad != B:
        pad = ((0, b_pad - B), (0, 0))
        anchors = jnp.pad(anchors, pad)
        neighbors = jnp.pad(neighbors, pad)
    num_blocks = b_pad // tb

    # Pass 1: per-block partials, batch axis fully parallel (megacore on v7x).
    col_partial, logsim_partial = pl.pallas_call(
        functools.partial(_scan_partials_kernel,
                          true_b=B, tb=tb, pad_rows=(b_pad != B)),
        out_shape=(
            jax.ShapeDtypeStruct((num_blocks, 1, N), jnp.float32),
            jax.ShapeDtypeStruct((num_blocks, 1, 1), jnp.float32),
        ),
        grid_spec=pltpu.PrefetchScalarGridSpec(
            num_scalar_prefetch=0,
            grid=(num_blocks,),
            in_specs=[
                pl.BlockSpec((tb, N), lambda i: (i, 0)),
                pl.BlockSpec((tb, N), lambda i: (i, 0)),
            ],
            out_specs=(
                pl.BlockSpec((1, 1, N), lambda i: (i, 0, 0)),
                pl.BlockSpec((1, 1, 1), lambda i: (i, 0, 0)),
            ),
        ),
        compiler_params=pltpu.CompilerParams(
            dimension_semantics=("parallel",),
            vmem_limit_bytes=32 * 1024 * 1024,
        ),
    )(anchors, neighbors)

    # Pass 2: tiny finalize — reduce partials to the three scalars.
    out = pl.pallas_call(
        functools.partial(_scan_finalize_kernel,
                          entropy_weight=float(entropy_weight), true_b=B),
        out_shape=jax.ShapeDtypeStruct((3,), jnp.float32),
        out_specs=pl.BlockSpec(memory_space=pltpu.SMEM),
    )(col_partial.reshape(num_blocks, N), logsim_partial.reshape(num_blocks, 1))
    return out[0], out[1], out[2]


def _reference(anchors, neighbors, entropy_weight=ENTROPY_WEIGHT):
    a_prob = jax.nn.softmax(anchors.astype(jnp.float32), axis=1)
    n_prob = jax.nn.softmax(neighbors.astype(jnp.float32), axis=1)
    sim = jnp.sum(a_prob * n_prob, axis=1)
    consistency = -jnp.mean(jnp.maximum(jnp.log(sim), -100.0))
    p = jnp.maximum(jnp.mean(a_prob, axis=0), EPS)
    entropy = -jnp.sum(p * jnp.log(p))
    total = consistency - entropy_weight * entropy
    return total, consistency, entropy


if __name__ == "__main__":
    key = jax.random.PRNGKey(0)
    k1, k2, k3, k4 = jax.random.split(key, 4)

    # Case 1: small single-tile problem (batch=8, 32 cluster logits).
    B, N = 8, 32
    anchors = jax.random.normal(k1, (B, N), dtype=jnp.float32)
    neighbors = jax.random.normal(k2, (B, N), dtype=jnp.float32)
    total, consistency, entropy = scan_loss(anchors, neighbors)
    jax.block_until_ready((total, consistency, entropy))

    ref_total, ref_cons, ref_ent = _reference(anchors, neighbors)
    assert jnp.allclose(total, ref_total, atol=1e-5, rtol=1e-5)
    assert jnp.allclose(consistency, ref_cons, atol=1e-5, rtol=1e-5)
    assert jnp.allclose(entropy, ref_ent, atol=1e-5, rtol=1e-5)

    # Case 2: multi-tile grid with a ragged final tile (exercises the
    # parallel per-block partials and the padded-row masking).
    B2, N2 = 36, 32
    a2 = jax.random.normal(k3, (B2, N2), dtype=jnp.float32)
    n2 = jax.random.normal(k4, (B2, N2), dtype=jnp.float32)
    t2, c2, e2 = scan_loss(a2, n2, block_rows=16)
    jax.block_until_ready((t2, c2, e2))

    rt2, rc2, re2 = _reference(a2, n2)
    assert jnp.allclose(t2, rt2, atol=1e-5, rtol=1e-5)
    assert jnp.allclose(c2, rc2, atol=1e-5, rtol=1e-5)
    assert jnp.allclose(e2, re2, atol=1e-5, rtol=1e-5)

    print("KERNEL_OK")
</pallas_src>

<mosaic_0001>
module attributes {stable_mosaic.version = 11 : i64} {
  func.func @_scan_partials_kernel(%arg0: i32, %arg1: memref<8x32xf32, #tpu.memory_space<vmem>>, %arg2: memref<8x32xf32, #tpu.memory_space<vmem>>, %arg3: memref<1x1x32xf32, #tpu.memory_space<vmem>>, %arg4: memref<1x1x1xf32, #tpu.memory_space<vmem>>) attributes {dimension_semantics = [#tpu.dimension_semantics<parallel>], iteration_bounds = array<i64: 1>, scalar_prefetch = 0 : i64, scratch_operands = 0 : i64, tpu.core_type = #tpu.core_type<tc>, window_params = [{transform_indices = @transform_0, window_bounds = array<i64: 8, 32>}, {transform_indices = @transform_1, window_bounds = array<i64: 8, 32>}, {transform_indices = @transform_2, window_bounds = array<i64: 1, 1, 32>}, {transform_indices = @transform_3, window_bounds = array<i64: 1, 1, 1>}]} {
    %c0 = arith.constant 0 : index
    %c0_0 = arith.constant 0 : index
    %0 = vector.load %arg1[%c0, %c0_0] : memref<8x32xf32, #tpu.memory_space<vmem>>, vector<8x32xf32>
    %c0_1 = arith.constant 0 : index
    %c0_2 = arith.constant 0 : index
    %1 = vector.load %arg2[%c0_1, %c0_2] : memref<8x32xf32, #tpu.memory_space<vmem>>, vector<8x32xf32>
    %cst = arith.constant dense<0xFF800000> : vector<8xf32>
    %2 = vector.multi_reduction <maximumf>, %0, %cst [1] : vector<8x32xf32> to vector<8xf32>
    %3 = vector.shape_cast %2 : vector<8xf32> to vector<8x1xf32>
    %4 = vector.broadcast %3 : vector<8x1xf32> to vector<8x32xf32>
    %5 = arith.subf %0, %4 : vector<8x32xf32>
    %6 = math.exp %5 : vector<8x32xf32>
    %cst_3 = arith.constant dense<0.000000e+00> : vector<8xf32>
    %7 = vector.multi_reduction <add>, %6, %cst_3 [1] : vector<8x32xf32> to vector<8xf32>
    %8 = vector.shape_cast %7 : vector<8xf32> to vector<8x1xf32>
    %cst_4 = arith.constant 1.000000e+00 : f32
    %9 = vector.broadcast %cst_4 : f32 to vector<8x1xf32>
    %10 = arith.divf %9, %8 : vector<8x1xf32>
    %cst_5 = arith.constant dense<0xFF800000> : vector<8xf32>
    %11 = vector.multi_reduction <maximumf>, %1, %cst_5 [1] : vector<8x32xf32> to vector<8xf32>
    %12 = vector.shape_cast %11 : vector<8xf32> to vector<8x1xf32>
    %13 = vector.broadcast %12 : vector<8x1xf32> to vector<8x32xf32>
    %14 = arith.subf %1, %13 : vector<8x32xf32>
    %15 = math.exp %14 : vector<8x32xf32>
    %cst_6 = arith.constant dense<0.000000e+00> : vector<8xf32>
    %16 = vector.multi_reduction <add>, %15, %cst_6 [1] : vector<8x32xf32> to vector<8xf32>
    %17 = vector.shape_cast %16 : vector<8xf32> to vector<8x1xf32>
    %cst_7 = arith.constant 1.000000e+00 : f32
    %18 = vector.broadcast %cst_7 : f32 to vector<8x1xf32>
    %19 = arith.divf %18, %17 : vector<8x1xf32>
    %20 = arith.mulf %6, %15 : vector<8x32xf32>
    %cst_8 = arith.constant dense<0.000000e+00> : vector<8xf32>
    %21 = vector.multi_reduction <add>, %20, %cst_8 [1] : vector<8x32xf32> to vector<8xf32>
    %22 = vector.shape_cast %21 : vector<8xf32> to vector<8x1xf32>
    %23 = arith.mulf %22, %10 : vector<8x1xf32>
    %24 = arith.mulf %23, %19 : vector<8x1xf32>
    %25 = math.log %24 : vector<8x1xf32>
    %cst_9 = arith.constant -1.000000e+02 : f32
    %26 = vector.broadcast %cst_9 : f32 to vector<8x1xf32>
    %27 = arith.maximumf %25, %26 : vector<8x1xf32>
    %cst_10 = arith.constant dense<0.000000e+00> : vector<1xf32>
    %28 = vector.multi_reduction <add>, %27, %cst_10 [0] : vector<8x1xf32> to vector<1xf32>
    %29 = vector.shape_cast %28 : vector<1xf32> to vector<1x1xf32>
    %c0_11 = arith.constant 0 : index
    %c0_12 = arith.constant 0 : index
    %c0_13 = arith.constant 0 : index
    %30 = vector.load %arg4[%c0_11, %c0_12, %c0_13] : memref<1x1x1xf32, #tpu.memory_space<vmem>>, vector<1x1x1xf32>
    %31 = vector.shape_cast %30 : vector<1x1x1xf32> to vector<1x1xf32>
    %32 = vector.shape_cast %29 : vector<1x1xf32> to vector<1x1x1xf32>
    tpu.vector_store %arg4[%c0_11, %c0_12, %c0_13], %32 {strides = array<i32>} : memref<1x1x1xf32, #tpu.memory_space<vmem>>, vector<1x1x1xf32>,
    %cst_14 = arith.constant dense<0.000000e+00> : vector<1x32xf32>
    %33 = tpu.matmul %10, %6, %cst_14 {dimension_numbers = #tpu.dot_dimension_numbers<[0], [0], [1], [1], [0, 1, 1, 1], [], []>} : vector<8x1xf32>, vector<8x32xf32>, vector<1x32xf32> -> vector<1x32xf32>
    %c0_15 = arith.constant 0 : index
    %c0_16 = arith.constant 0 : index
    %c0_17 = arith.constant 0 : index
    %34 = vector.load %arg3[%c0_15, %c0_16, %c0_17] : memref<1x1x32xf32, #tpu.memory_space<vmem>>, vector<1x1x32xf32>
    %35 = vector.shape_cast %34 : vector<1x1x32xf32> to vector<1x32xf32>
    %36 = vector.shape_cast %33 : vector<1x32xf32> to vector<1x1x32xf32>
    tpu.vector_store %arg3[%c0_15, %c0_16, %c0_17], %36 {strides = array<i32>} : memref<1x1x32xf32, #tpu.memory_space<vmem>>, vector<1x1x32xf32>,
    return
  }
  func.func @transform_0(%arg0: i32) -> (i32, i32) {
    %c0_i32 = arith.constant 0 : i32
    %c0_i32_0 = arith.constant 0 : i32
    return %arg0, %c0_i32 : i32, i32
  }
  func.func @transform_1(%arg0: i32) -> (i32, i32) {
    %c0_i32 = arith.constant 0 : i32
    %c0_i32_0 = arith.constant 0 : i32
    return %arg0, %c0_i32 : i32, i32
  }
  func.func @transform_2(%arg0: i32) -> (i32, i32, i32) {
    %c0_i32 = arith.constant 0 : i32
    %c0_i32_0 = arith.constant 0 : i32
    %c0_i32_1 = arith.constant 0 : i32
    return %arg0, %c0_i32, %c0_i32_0 : i32, i32, i32
  }
  func.func @transform_3(%arg0: i32) -> (i32, i32, i32) {
    %c0_i32 = arith.constant 0 : i32
    %c0_i32_0 = arith.constant 0 : i32
    %c0_i32_1 = arith.constant 0 : i32
    return %arg0, %c0_i32, %c0_i32_0 : i32, i32, i32
  }
}

</mosaic_0001>

<bundles_post_ra>
// kernel: tpu_custom_call.1
= control target key start
LH: loop header
LB: loop body
LE: loop exit
PB: predicated region body
PF: predicated region fallthrough
CT: control target
= control target key end

     0   :  { %9 = vsyncpa [#allocation3], 0  ;;  %s418_s0 = inlined_call_operand.hbm [shape: f32[8,32], index: 0, kind: input, shape index: {}]   ;;  %s419_s1 = inlined_call_operand.hbm [shape: f32[8,32], index: 1, kind: input, shape index: {}]   ;;  %s420_s2 = inlined_call_operand.hbm [shape: f32[1,1,32], index: 2, kind: output, shape index: {0}]   ;;  %s421_s3 = inlined_call_operand.hbm [shape: f32[1,1,1], index: 3, kind: output, shape index: {1}]  }
   0x1   :  { %10 = vsyncpa [#allocation6], 0 }
   0x2   :  { %11 = vsyncpa [#allocation4], 0 }
   0x3   :  { %12 = vsyncpa [#allocation9], 0  ;;  %s339_s12 = smov [#allocation2]   ;;  %s340_s14 = smov [#allocation5]  }
   0x4   :  { %s19_s13 = sshll.u32 %s339_s12, 4  ;;  %s29_s15 = sshll.u32 %s340_s14, 4  ;;  %s20_s13 = int_to_ptr.vmem [resolvable:$true] %s19_s13  ;;  %s30_s15 = int_to_ptr.vmem [resolvable:$true] %s29_s15 }
   0x5   :  { %s243_s18 = scalar_lea.hbm %s418_s0, 128 }
   0x6   :  { %p244_p0 = scmp.ne.s32.totalorder %s418_s0, %s243_s18  ;;  %p247_p1 = scmp.lt.u32.totalorder %s243_s18, %s418_s0 }
   0x8   :  { %p249_p2 = pnand %p247_p1, %p244_p0 }
   0xa   :  { %252 = shalt.err (!%p249_p2)
}
   0xb   :  { %s253_s23 = scalar_lea.vmem %s20_s13, 128  ;;  %p258_p4 = scmp.lt.s32.totalorder %s20_s13, %s20_s13 }
   0xc   :  { %p254_p3 = scmp.ne.s32.totalorder %s20_s13, %s253_s23  ;;  %p259_p5 = scmp.lt.s32.totalorder %s253_s23, %s253_s23 }
   0xe   :  { %p260_p6 = por %p259_p5, %p258_p4 }
  0x10   :  { %p261_p7 = pnand %p260_p6, %p254_p3 }
  0x12   :  { %264 = shalt.err (!%p261_p7)
}
  0x13   :  { %22 = dma.hbm_to_vmem [thread:$0]  %s418_s0, 128, %s20_s13, [#allocation3]  }
  0x14   :  { %s265_s28 = scalar_lea.hbm %s419_s1, 128 }
  0x15   :  { %p266_p8 = scmp.ne.s32.totalorder %s419_s1, %s265_s28  ;;  %p269_p9 = scmp.lt.u32.totalorder %s265_s28, %s419_s1 }
  0x17   :  { %p271_p10 = pnand %p269_p9, %p266_p8 }
  0x19   :  { %274 = shalt.err (!%p271_p10)
}
  0x1a   :  { %s275_s6 = scalar_lea.vmem %s30_s15, 128  ;;  %p280_p12 = scmp.lt.s32.totalorder %s30_s15, %s30_s15 }
  0x1b   :  { %p276_p11 = scmp.ne.s32.totalorder %s30_s15, %s275_s6  ;;  %p281_p13 = scmp.lt.s32.totalorder %s275_s6, %s275_s6 }
  0x1d   :  { %p282_p0 = por %p281_p13, %p280_p12 }
  0x1f   :  { %p283_p1 = pnand %p282_p0, %p276_p11 }
  0x21   :  { %286 = shalt.err (!%p283_p1)
}
  0x22   :  { %32 = dma.hbm_to_vmem [thread:$0]  %s419_s1, 128, %s30_s15, [#allocation6]  }
  0x23   :  { %331 = dma.done.wait [#allocation3], 128  }
  0x24   :  { %332 = vsyncadd [#allocation3], 4294967168 }
  0x25   :  { %333 = dma.done.wait [#allocation6], 128  }
  0x26   :  { %334 = vsyncadd [#allocation6], 4294967168  ;;  %vm41_vm0 = vcmask 261120   ;;  %v39_v0 = vld [vmem:[#allocation2] sm:$0xff]  ;;  %v341_v2 = vmov 0.0   ;;  %vm342_vm1 = vmmov 0  }
  0x27   :  { %v42_v1 = vsel %vm41_vm0, %v39_v0, -inf  ;;  %222 = vmatprep.subr.mxu0 %v341_v2  ;;  %224 = vmatprep.mubr.msk.f32.mxu0 %vm342_vm1, %v341_v2  ;;  %v40_v10 = vld [vmem:[#allocation5] sm:$0xff]  ;;  %vm113_vm2 = vcmask 64512   ;;  %s343_s1 = smov [#allocation7]   ;;  %vm187_vm3 = vcmask 253952  }
  0x28   :  { %43 = vmax.xlane.f32.xlu0 %v42_v1  ;;  %v53_v11 = vsel %vm41_vm0, %v40_v10, -inf  ;;  %s195_s8 = sshll.u32 %s343_s1, 4  ;;  %s196_s8 = int_to_ptr.vmem [resolvable:$true] %s195_s8 }
  0x29   :  { %s287_s9 = scalar_lea.vmem %s196_s8, 16  ;;  %s291_s10 = scalar_lea.vmem %s196_s8, 32 }
  0x2a   :  { %p288_p2 = scmp.ne.s32.totalorder %s196_s8, %s287_s9  ;;  %p292_p3 = scmp.lt.s32.totalorder %s196_s8, %s196_s8 }
  0x2b   :  { %p293_p4 = scmp.lt.s32.totalorder %s291_s10, %s287_s9 }
  0x2d   :  { %p294_p5 = por %p293_p4, %p292_p3 }
  0x2f   :  { %p295_p6 = pnand %p294_p5, %p288_p2 }
  0xb5   :  { %v44_v3 = vpop.xlane.xlu0 %43 }
  0xb6   :  { %v45_v4 = vsub.f32 %v39_v0, %v44_v3 }
  0xb8   :  { %v46_v5 = vmul.f32 1.442695, %v45_v4 }
  0xba   :  { %233 = vpow2.f32 %v46_v5 }
  0xc4   :  { %v234_v6 = vpop.eup %233 }
  0xc5   :  { %223 = vmatpush3.msra.mxu0 %v234_v6  ;;  %v48_v7 = vsel %vm41_vm0, %v234_v6, 0.0 }
  0xc6   :  { %49 = vadd.xlane.f32.xlu0 %v48_v7 }
 0x153   :  { %v50_v8 = vpop.xlane.xlu0 %49 }
 0x154   :  { %235 = vrcp.f32 %v50_v8 }
 0x15e   :  { %v236_v9 = vpop.eup %235 }
 0x15f   :  { %81 = vxpose.xlu1.b32.start.end [1/1] (short) (narrow) %v236_v9, 8 }
 0x186   :  { %54 = vmax.xlane.f32.xlu1 %v53_v11 }
 0x1df   :  { %v97_v12 = vpop.trf.xlu1 }
 0x1e0   :  { %225 = vmatmul.mubr.msk.f32.vlgmr.msra.gmra.mrb[0].mxu0 %vm113_vm2, %v97_v12 }
 0x213   :  { %v55_v13 = vpop.xlane.xlu1 %54 }
 0x214   :  { %v56_v14 = vsub.f32 %v40_v10, %v55_v13 }
 0x216   :  { %v57_v15 = vmul.f32 1.442695, %v56_v14 }
 0x218   :  { %237 = vpow2.f32 %v57_v15 }
 0x222   :  { %v238_v16 = vpop.eup %237 }
 0x223   :  { %v59_v17 = vsel %vm41_vm0, %v238_v16, 0.0  ;;  %v64_v18 = vmul.f32 %v238_v16, %v234_v6 }
 0x224   :  { %60 = vadd.xlane.f32.xlu0 %v59_v17 }
 0x225   :  { %v65_v19 = vsel %vm41_vm0, %v64_v18, 0.0 }
 0x228   :  { %66 = vadd.xlane.f32.xlu0 %v65_v19 }
 0x2b1   :  { %v61_v20 = vpop.xlane.xlu0 %60 }
 0x2b2   :  { %239 = vrcp.f32 %v61_v20 }
 0x2b3   :  { %v183_v21 = vpop.f32.mrb[0].mxu0 }
 0x2b4   :  { %v226_v22 = vpop.f32.mrb[1].mxu0  ;;  %188 = vst.msk [vmem:[#allocation7] sm:$0x1] %vm187_vm3, %v183_v21 }
 0x2b5   :  { %298 = shalt.err (!%p295_p6)
}
 0x2b6   :  { %s299_s13 = scalar_lea.hbm %s420_s2, 16 }
 0x2b7   :  { %p300_p7 = scmp.ne.s32.totalorder %s420_s2, %s299_s13  ;;  %p303_p8 = scmp.lt.u32.totalorder %s299_s13, %s420_s2 }
 0x2b9   :  { %p305_p9 = pnand %p303_p8, %p300_p7 }
 0x2bb   :  { %308 = shalt.err (!%p305_p9)
}
 0x2bc   :  { %198 = dma.vmem_to_hbm [thread:$0]  %s196_s8, 16, %s420_s2, [#allocation4]   ;;  %v67_v23 = vpop.xlane.xlu0 %66  ;;  %v240_v25 = vpop.eup %239  ;;  %vm79_vm4 = vcmask 0  }
 0x2bd   :  { %v68_v24 = vmul.f32 %v236_v9, %v67_v23  ;;  %s344_s20 = smov [#allocation8]  }
 0x2be   :  { %s205_s21 = sshll.u32 %s344_s20, 4  ;;  %s206_s21 = int_to_ptr.vmem [resolvable:$true] %s205_s21 }
 0x2bf   :  { %v69_v26 = vmul.f32 %v240_v25, %v68_v24  ;;  %s309_s2 = scalar_lea.vmem %s206_s21, 16  ;;  %s313_s22 = scalar_lea.vmem %s206_s21, 32 }
 0x2c0   :  { %p310_p10 = scmp.ne.s32.totalorder %s206_s21, %s309_s2  ;;  %p314_p11 = scmp.lt.s32.totalorder %s206_s21, %s206_s21 }
 0x2c1   :  { %241 = vlog2.f32 %v69_v26  ;;  %p315_p12 = scmp.lt.s32.totalorder %s313_s22, %s309_s2 }
 0x2c3   :  { %p316_p13 = por %p315_p12, %p314_p11 }
 0x2c5   :  { %p317_p0 = pnand %p316_p13, %p310_p10 }
 0x2cb   :  { %v242_v27 = vpop.eup %241 }
 0x2cc   :  { %v71_v28 = vmul.f32 0.6931472, %v242_v27 }
 0x2ce   :  { %v72_v29 = vmax.f32 %v71_v28, -100.0 }
 0x2d0   :  { %v73_v30 = vrot.slane %v72_v29, 4 }
 0x2d2   :  { %v74_v31 = vadd.f32 %v73_v30, %v72_v29 }
 0x2d4   :  { %v75_v32 = vrot.slane %v74_v31, 2 }
 0x2d6   :  { %v76_v33 = vadd.f32 %v75_v32, %v74_v31 }
 0x2d8   :  { %v77_v34 = vrot.slane %v76_v33, 1 }
 0x2da   :  { %v78_v35 = vadd.f32 %v77_v34, %v76_v33 }
 0x2dc   :  { %80 = vst.msk [vmem:[#allocation8] sm:$0x1] %vm79_vm4, %v78_v35 }
 0x2dd   :  { %320 = shalt.err (!%p317_p0)
}
 0x2de   :  { %s321_s25 = scalar_lea.hbm %s421_s3, 16 }
 0x2df   :  { %p322_p1 = scmp.ne.s32.totalorder %s421_s3, %s321_s25  ;;  %p325_p2 = scmp.lt.u32.totalorder %s321_s25, %s421_s3 }
 0x2e1   :  { %p327_p3 = pnand %p325_p2, %p322_p1 }
 0x2e3   :  { %330 = shalt.err (!%p327_p3)
}
 0x2e4   :  { %208 = dma.vmem_to_hbm [thread:$0]  %s206_s21, 16, %s421_s3, [#allocation9]  }
 0x2e5   :  { %335 = dma.done.wait [#allocation4], 16  }
 0x2e6   :  { %336 = vsyncadd [#allocation4], 4294967280 }
 0x2e7   :  { %337 = dma.done.wait [#allocation9], 16  }
 0x2e8   :  { %338 = vsyncadd [#allocation9], 4294967280 }
 0x2e9   :  { %215 = vsyncpa [#allocation3], 1 }
 0x2ea   :  { %216 = vsyncpa [#allocation6], 1 }
 0x2eb   :  { %217 = vsyncpa [#allocation4], 1 }
 0x2ec   :  { %218 = vsyncpa [#allocation9], 1 }

</bundles_post_ra>
